<compile_context>
chip_gen: v7x
topology: tpu7x:2x2x1
jax: 0.10.0
libtpu: 0.0.40
codegen_flags: <defaults>
</compile_context>

<pallas_src>
import jax
import jax.numpy as jnp
from jax.experimental import pallas as pl
from jax.experimental.pallas import tpu as pltpu

_LANE = 128
_VMEM_LIMIT = 32 * 1024 * 1024  # fits v5e/v6e (128 MiB) and v7x (64 MiB) VMEM


def _pick_tile(v, cap):
    """Largest multiple of 128 that divides v and is <= cap; else full v."""
    if v % _LANE != 0 or v <= cap:
        return v
    t = (cap // _LANE) * _LANE
    while t >= _LANE:
        if v % t == 0:
            return t
        t -= _LANE
    return v


def _layer1_kernel(x_ref, w1_ref, h_ref):
    # x_ref: (N, TILE_V) slice of the context rows; w1_ref: (TILE_V, D).
    # h_ref: (1, D) f32 accumulator, resident across the reduction grid axis.
    @pl.when(pl.program_id(0) == 0)
    def _init():
        h_ref[...] = jnp.zeros_like(h_ref)

    # mean hoisted before the matmul: mean(x, 0) @ W1 == mean(x @ W1, 0)
    x_mean = jnp.mean(x_ref[...].astype(jnp.float32), axis=0, keepdims=True)
    h_ref[...] += jnp.dot(x_mean, w1_ref[...],
                          preferred_element_type=jnp.float32)


def _layer2_kernel(h_ref, w2_ref, b2_ref, out_ref):
    # h_ref: (1, D) f32; w2_ref: (D, TILE_V); b2/out: (1, TILE_V) lane-dense.
    y = jnp.dot(h_ref[...], w2_ref[...], preferred_element_type=jnp.float32)
    out_ref[...] = (y + b2_ref[...].astype(jnp.float32)).astype(out_ref.dtype)


def word2vec_forward(x, w1, w2, b2, *, tile_v1=2048, tile_v2=2048):
    """CBOW word2vec forward.

    x : (N, V)  context rows (one-hot or dense), float
    w1: (V, D)  == torch layer1.weight.T   (f32 or bf16)
    w2: (D, V)  == torch layer2.weight.T   (f32 or bf16)
    b2: (V,) or (1, V)
    returns (V,) float32
    """
    n, vocab = x.shape
    v1, d = w1.shape
    assert v1 == vocab and w2.shape == (d, vocab)
    b2 = b2.reshape(1, vocab)

    tv1 = _pick_tile(vocab, tile_v1)
    tv2 = _pick_tile(vocab, tile_v2)

    # ---- layer 1: h = mean(x, 0) @ W1, tiled over the V contraction axis ----
    h = pl.pallas_call(
        _layer1_kernel,
        out_shape=jax.ShapeDtypeStruct((1, d), jnp.float32),
        grid=(vocab // tv1,),
        in_specs=[
            pl.BlockSpec((n, tv1), lambda k: (0, k)),
            pl.BlockSpec((tv1, d), lambda k: (k, 0)),
        ],
        out_specs=pl.BlockSpec((1, d), lambda k: (0, 0)),
        compiler_params=pltpu.CompilerParams(
            dimension_semantics=("arbitrary",),   # reduction axis
            vmem_limit_bytes=_VMEM_LIMIT,
        ),
        cost_estimate=pl.CostEstimate(
            flops=2 * vocab * d + n * vocab,
            transcendentals=0,
            bytes_accessed=vocab * d * jnp.dtype(w1.dtype).itemsize
            + n * vocab * jnp.dtype(x.dtype).itemsize + 4 * d,
        ),
    )(x, w1)

    # ---- layer 2: y = h @ W2 + b2, tiled over the V output axis ----
    y = pl.pallas_call(
        _layer2_kernel,
        out_shape=jax.ShapeDtypeStruct((1, vocab), jnp.float32),
        grid=(vocab // tv2,),
        in_specs=[
            pl.BlockSpec((1, d), lambda j: (0, 0)),
            pl.BlockSpec((d, tv2), lambda j: (0, j)),
            pl.BlockSpec((1, tv2), lambda j: (0, j)),
        ],
        out_specs=pl.BlockSpec((1, tv2), lambda j: (0, j)),
        compiler_params=pltpu.CompilerParams(
            dimension_semantics=("parallel",),    # independent V tiles
            vmem_limit_bytes=_VMEM_LIMIT,
        ),
        cost_estimate=pl.CostEstimate(
            flops=2 * vocab * d,
            transcendentals=0,
            bytes_accessed=vocab * d * jnp.dtype(w2.dtype).itemsize
            + vocab * 8 + 4 * d,
        ),
    )(h, w2, b2)

    return y[0]  # (V,), matches the 1-D PyTorch output


if __name__ == "__main__":
    # Small shapes consistent with the module:
    #   vocab_size = 256, vector_size = 128, window = 4 -> N = 2*window = 8
    vocab_size = 256
    vector_size = 128
    window = 4
    n_ctx = 2 * window

    key = jax.random.PRNGKey(0)
    k_x, k_w1, k_w2, k_b2 = jax.random.split(key, 4)

    # torch layer1.weight: (D, V) -> stored transposed; layer2.weight: (V, D) -> transposed.
    w1 = jax.random.normal(k_w1, (vocab_size, vector_size), jnp.float32) * 0.02
    w2 = jax.random.normal(k_w2, (vector_size, vocab_size), jnp.float32) * 0.02
    b2 = jax.random.normal(k_b2, (vocab_size,), jnp.float32) * 0.02

    idx = jax.random.randint(k_x, (n_ctx,), 0, vocab_size)
    x = jax.nn.one_hot(idx, vocab_size, dtype=jnp.float32)

    # f32 path with small tiles so both grids actually iterate (grid=(2,)).
    y = word2vec_forward(x, w1, w2, b2, tile_v1=128, tile_v2=128)
    jax.block_until_ready(y)
    ref = jnp.mean(x @ w1, axis=0) @ w2 + b2
    assert y.shape == (vocab_size,)
    assert jnp.allclose(y, ref, atol=1e-5, rtol=1e-5)

    # bf16-weight path (halves W1/W2 HBM bytes; f32 accumulation in-kernel).
    w1_bf, w2_bf = w1.astype(jnp.bfloat16), w2.astype(jnp.bfloat16)
    y_bf = word2vec_forward(x, w1_bf, w2_bf, b2)
    jax.block_until_ready(y_bf)
    ref_bf = (jnp.mean(x, axis=0) @ w1_bf.astype(jnp.float32)
              ) @ w2_bf.astype(jnp.float32) + b2
    assert jnp.allclose(y_bf, ref_bf, atol=1e-3, rtol=1e-3)

    print("KERNEL_OK")
</pallas_src>

<mosaic_0001>
module attributes {stable_mosaic.version = 11 : i64} {
  func.func @_layer1_kernel(%arg0: i32, %arg1: memref<8x128xf32, #tpu.memory_space<vmem>>, %arg2: memref<128x128xf32, #tpu.memory_space<vmem>>, %arg3: memref<1x128xf32, #tpu.memory_space<vmem>>) attributes {dimension_semantics = [#tpu.dimension_semantics<arbitrary>], iteration_bounds = array<i64: 2>, scalar_prefetch = 0 : i64, scratch_operands = 0 : i64, tpu.core_type = #tpu.core_type<tc>, window_params = [{transform_indices = @transform_0, window_bounds = array<i64: 8, 128>}, {transform_indices = @transform_1, window_bounds = array<i64: 128, 128>}, {pipeline_mode = #tpu.pipeline_mode<synchronous>, transform_indices = @transform_2, window_bounds = array<i64: 1, 128>}]} {
    %c0_i32 = arith.constant 0 : i32
    %0 = arith.cmpi eq, %arg0, %c0_i32 : i32
    %1 = arith.extui %0 : i1 to i32
    %c0_i32_0 = arith.constant 0 : i32
    %2 = arith.cmpi ne, %1, %c0_i32_0 : i32
    scf.if %2 {
      %cst_10 = arith.constant 0.000000e+00 : f32
      %13 = vector.broadcast %cst_10 : f32 to vector<1x128xf32>
      %c0_11 = arith.constant 0 : index
      %c0_12 = arith.constant 0 : index
      %14 = vector.load %arg3[%c0_11, %c0_12] : memref<1x128xf32, #tpu.memory_space<vmem>>, vector<1x128xf32>
      tpu.vector_store %arg3[%c0_11, %c0_12], %13 {strides = array<i32>} : memref<1x128xf32, #tpu.memory_space<vmem>>, vector<1x128xf32>,
    } else {
    }
    %c0 = arith.constant 0 : index
    %c0_1 = arith.constant 0 : index
    %3 = vector.load %arg1[%c0, %c0_1] : memref<8x128xf32, #tpu.memory_space<vmem>>, vector<8x128xf32>
    %cst = arith.constant dense<0.000000e+00> : vector<128xf32>
    %4 = vector.multi_reduction <add>, %3, %cst [0] : vector<8x128xf32> to vector<128xf32>
    %5 = vector.shape_cast %4 : vector<128xf32> to vector<1x128xf32>
    %cst_2 = arith.constant 8.000000e+00 : f32
    %6 = vector.broadcast %cst_2 : f32 to vector<1x128xf32>
    %7 = arith.divf %5, %6 : vector<1x128xf32>
    %c0_3 = arith.constant 0 : index
    %c0_4 = arith.constant 0 : index
    %8 = vector.load %arg3[%c0_3, %c0_4] : memref<1x128xf32, #tpu.memory_space<vmem>>, vector<1x128xf32>
    %c0_5 = arith.constant 0 : index
    %c0_6 = arith.constant 0 : index
    %9 = vector.load %arg2[%c0_5, %c0_6] : memref<128x128xf32, #tpu.memory_space<vmem>>, vector<128x128xf32>
    %cst_7 = arith.constant dense<0.000000e+00> : vector<1x128xf32>
    %10 = tpu.matmul %7, %9, %cst_7 {dimension_numbers = #tpu.dot_dimension_numbers<[1], [0], [0], [1], [0, 0, 1, 1], [], []>} : vector<1x128xf32>, vector<128x128xf32>, vector<1x128xf32> -> vector<1x128xf32>
    %11 = arith.addf %8, %10 : vector<1x128xf32>
    %c0_8 = arith.constant 0 : index
    %c0_9 = arith.constant 0 : index
    %12 = vector.load %arg3[%c0_8, %c0_9] : memref<1x128xf32, #tpu.memory_space<vmem>>, vector<1x128xf32>
    tpu.vector_store %arg3[%c0_8, %c0_9], %11 {strides = array<i32>} : memref<1x128xf32, #tpu.memory_space<vmem>>, vector<1x128xf32>,
    return
  }
  func.func @transform_0(%arg0: i32) -> (i32, i32) {
    %c0_i32 = arith.constant 0 : i32
    %c0_i32_0 = arith.constant 0 : i32
    return %c0_i32, %arg0 : i32, i32
  }
  func.func @transform_1(%arg0: i32) -> (i32, i32) {
    %c0_i32 = arith.constant 0 : i32
    %c0_i32_0 = arith.constant 0 : i32
    return %arg0, %c0_i32 : i32, i32
  }
  func.func @transform_2(%arg0: i32) -> (i32, i32) {
    %c0_i32 = arith.constant 0 : i32
    %c0_i32_0 = arith.constant 0 : i32
    %c0_i32_1 = arith.constant 0 : i32
    return %c0_i32, %c0_i32_0 : i32, i32
  }
}

</mosaic_0001>

<bundles_post_ra>
// kernel: tpu_custom_call.1
= control target key start
LH: loop header
LB: loop body
LE: loop exit
PB: predicated region body
PF: predicated region fallthrough
CT: control target
= control target key end

     0   :  { %7 = vsyncpa [#allocation3], 0  ;;  %s868_s0 = inlined_call_operand.hbm [shape: f32[8,256], index: 0, kind: input, shape index: {}]   ;;  %s869_s1 = inlined_call_operand.hbm [shape: f32[256,128], index: 1, kind: input, shape index: {}]   ;;  %s870_s2 = inlined_call_operand.hbm [shape: f32[1,128], index: 2, kind: output, shape index: {}]  }
   0x1   :  { %9 = vsyncpa [#allocation3 + $0x1], 0 }
   0x2   :  { %10 = vsyncpa [#allocation6], 0 }
   0x3   :  { %12 = vsyncpa [#allocation6 + $0x1], 0 }
   0x4   :  { %13 = vsyncpa [#allocation4], 0  ;;  %s675_s9 = smov 0   ;;  %s677_s10 = smov 0  }
   0x5   :  { %s679_s11 = smov 0   ;;  %s681_s12 = smov 0  }
   0x6 LB: > { %s694_s13 = sadd.s32 4294967295, %s649_s12   ;;  %s697_s14 = sadd.s32 1, %s649_s12   ;;  %s649_s12 = sphi %s681_s12, %s881_s12   ;;  %s645_s11 = sphi %s679_s11, %s880_s11   ;;  %s641_s10 = sphi %s677_s10, %s879_s10   ;;  %s637_s9 = sphi %s675_s9, %s878_s9  }
   0x7   : > { %s23_s15 = ssub.s32 %s649_s12, %s697_s14  ;;  %s26_s16 = sadd.s32 1, %s645_s11 }
   0x8   : > { %p24_p0 = scmp.eq.s32.totalorder %s23_s15, 0  ;;  %p33_p1 = scmp.ne.s32.totalorder %s645_s11, %s641_s10 }
   0x9   : > { %p34_p2 = scmp.eq.s32.totalorder %s649_s12, 0  ;;  %p39_p3 = scmp.ne.s32.totalorder %s641_s10, %s637_s9 }
   0xa   : > { %s707_s17 = scalar_select %p24_p0, %s645_s11, %s26_s16  }
   0xb   : > { %p35_p4 = por %p34_p2, %p33_p1  ;;  %p40_p5 = scmp.eq.s32.totalorder %s694_s13, 0 }
   0xc   : > { %p479_p6 = scmp.lt.s32.totalorder %s649_s12, 2  ;;  %s716_s19 = sand.u32 1, %s645_s11  }
   0xd   : > { %p711_p7 = por %p40_p5, %p39_p3  ;;  %s374_s20 = sshll.u32 %s716_s19, 3 }
   0xe   : > { %s375_s21 = sshll.u32 %s649_s12, 7  ;;  %s114_s25 = scalar_lea.vmem [#allocation2], %s374_s20 }
   0xf   : > { %s872_s18 = scalar_select %p711_p7, 1, 0 }
  0x10   : > { %s723_s24 = scalar_lea.hbm %s868_s0, %s375_s21  ;;  %s121_s26 = sshll.u32 %s114_s25, 4  ;;  %s725_s26 = int_to_ptr.vmem [resolvable:$true] %s121_s26 }
  0x11   : > { %p727_p8 = pnand %p479_p6, %p35_p4  ;;  %s111_s28 = scalar_lea.sflag [#allocation3], %s716_s19 }
  0x12   : > { %s521_s29 = scalar_lea.hbm %s723_s24, 128  ;;  %s526_s4 = scalar_lea.hbm %s868_s0, 256 }
  0x13   : > { %p522_p11 = scmp.ne.s32.totalorder %s723_s24, %s521_s29  ;;  %p523_p12 = pneg %p727_p8 }
  0x14   : > { %p527_p1 = scmp.lt.u32.totalorder %s723_s24, %s868_s0  ;;  %p528_p2 = scmp.lt.u32.totalorder %s526_s4, %s521_s29 }
  0x15   : > { %p524_p13 = pnand %p523_p12, %p522_p11  ;;  %p530_p4 = scmp.lt.u32.totalorder %s521_s29, %s723_s24 }
  0x16   : > { %p529_p3 = por %p528_p2, %p527_p1 }
  0x17   : > { %p525_p0 = pneg %p524_p13 }
  0x18   : > { %p531_p5 = por %p530_p4, %p529_p3 }
  0x1a   : > { %p532_p6 = pnand %p531_p5, %p525_p0 }
  0x1c   : > { %535 = shalt.err (!%p532_p6)
}
  0x1d   : > { %s536_s7 = scalar_lea.vmem %s725_s26, 128  ;;  %s651_s8 = smov [#allocation2]  }
  0x1e   : > { %p537_p11 = scmp.ne.s32.totalorder %s725_s26, %s536_s7  ;;  %s541_s9 = sshll.u32 %s651_s8, 4  ;;  %s542_s9 = int_to_ptr.vmem [resolvable:$false] %s541_s9 }
  0x1f   : > { %s543_s15 = scalar_lea.vmem %s542_s9, 256  ;;  %p544_p10 = scmp.lt.s32.totalorder %s725_s26, %s542_s9 }
  0x20   : > { %p539_p13 = pnand %p537_p11, %p523_p12  ;;  %p545_p1 = scmp.lt.s32.totalorder %s543_s15, %s536_s7 }
  0x22   : > { %p540_p9 = pneg %p539_p13  ;;  %p546_p2 = por %p545_p1, %p544_p10 }
  0x24   : > { %p547_p3 = pnand %p546_p2, %p540_p9 }
  0x26   : > { %550 = shalt.err (!%p547_p3)
}
  0x27   : > { %475 = dma.hbm_to_vmem [thread:$0]  (!%p727_p8), %s723_s24, 128, %s725_s26, %s111_s28  }
  0x28   : > { %p874_p0 = scmp.lt.s32.totalorder %s649_s12, 3  ;;  %p875_p4 = scmp.ge.s32.totalorder %s649_s12, 1 }
  0x29   : > { %s376_s20 = sshll.u32 %s716_s19, 7  ;;  %s387_s21 = sshll.u32 %s649_s12, 11 }
  0x2a   : > { %p763_p5 = pnand %p875_p4, %p874_p0  ;;  %s772_s25 = scalar_lea.hbm %s869_s1, %s387_s21 }
  0x2b   : > { %s132_s29 = scalar_lea.vmem [#allocation5], %s376_s20  ;;  %s129_s24 = scalar_lea.sflag [#allocation6], %s716_s19 }
  0x2c   : > { %s139_s30 = sshll.u32 %s132_s29, 4  ;;  %s551_s26 = scalar_lea.hbm %s772_s25, 2048  ;;  %s774_s30 = int_to_ptr.vmem [resolvable:$true] %s139_s30 }
  0x2d   : > { %p552_p9 = scmp.ne.s32.totalorder %s772_s25, %s551_s26  ;;  %s556_s3 = scalar_lea.hbm %s869_s1, 4096 }
  0x2e   : > { %p557_p11 = scmp.lt.u32.totalorder %s772_s25, %s869_s1  ;;  %p558_p13 = scmp.lt.u32.totalorder %s556_s3, %s551_s26 }
  0x2f   : > { %p554_p10 = pnand %p552_p9, %p523_p12  ;;  %p560_p2 = scmp.lt.u32.totalorder %s551_s26, %s772_s25 }
  0x30   : > { %p559_p1 = por %p558_p13, %p557_p11 }
  0x31   : > { %p555_p6 = pneg %p554_p10 }
  0x32   : > { %p561_p3 = por %p560_p2, %p559_p1 }
  0x34   : > { %p562_p0 = pnand %p561_p3, %p555_p6 }
  0x36   : > { %565 = shalt.err (!%p562_p0)
}
  0x37   : > { %s566_s6 = scalar_lea.vmem %s774_s30, 2048  ;;  %s652_s7 = smov [#allocation5]  }
  0x38   : > { %p567_p4 = scmp.ne.s32.totalorder %s774_s30, %s566_s6  ;;  %s571_s8 = sshll.u32 %s652_s7, 4  ;;  %s572_s8 = int_to_ptr.vmem [resolvable:$false] %s571_s8 }
  0x39   : > { %s573_s9 = scalar_lea.vmem %s572_s8, 4096  ;;  %p574_p7 = scmp.lt.s32.totalorder %s774_s30, %s572_s8 }
  0x3a   : > { %p569_p9 = pnand %p567_p4, %p523_p12  ;;  %p575_p11 = scmp.lt.s32.totalorder %s573_s9, %s566_s6 }
  0x3c   : > { %p570_p10 = pneg %p569_p9  ;;  %p576_p13 = por %p575_p11, %p574_p7 }
  0x3e   : > { %p577_p1 = pnand %p576_p13, %p570_p10 }
  0x40   : > { %580 = shalt.err (!%p577_p1)
}
  0x41   : > { %s653_s15 = smov 128   ;;  %s654_s20 = smov 8  }
  0x42   : > { %478 = dma.hbm_to_vmem [thread:$0]  (!%p727_p8), %s772_s25, 2048, %s774_s30, %s129_s24, %s653_s15, %s653_s15, %s654_s20  }
  0x43   : > { %151 = sbr.rel (%p763_p5) target bundleno = 350 (0x15e), region = 28  ;;  %s153_s21 = sand.u32 (!%p763_p5), 1, %s641_s10  }
  0x44   : > { %s380_s22 = sshll.u32 (!%p763_p5), %s153_s21, 3  ;;  %s154_s23 = scalar_lea.sflag (!%p763_p5), [#allocation3], %s153_s21 }
  0x45   : > { %s157_s29 = scalar_lea.vmem (!%p763_p5), [#allocation2], %s380_s22  ;;  %p877_p7 = scmp.ne.s32.totalorder (!%p763_p5), %s872_s18, 0 }
  0x4a   : > { %624 = dma.done.wait (%p877_p7), %s154_s23, 128  }
  0x4b   : > { %626 = vsyncadd (%p877_p7), %s154_s23, 4294967168  ;;  %s381_s26 = sshll.u32 %s153_s21, 7  ;;  %s163_s12 = scalar_lea.sflag [#allocation6], %s153_s21 }
  0x4c   : > { %s809_s27 = scalar_lea.vmem [#allocation5], %s381_s26 }
  0x4d   : > { %628 = dma.done.wait (%p877_p7), %s163_s12, 2048  }
  0x4e   : > { %630 = vsyncadd (%p877_p7), %s163_s12, 4294965248  ;;  %p382_p8 = scmp.ne.s32.totalorder %s694_s13, 0 }
  0x4f   : > { %v655_v0 = vmov (!%p382_p8), 0.0  }
  0x50   : > { %191 = sbr.rel (%p382_p8) target bundleno = 87 (0x57), region = 40  ;;  %192 = vst [vmem:[#allocation7] sm:$0x1] (!%p382_p8), %v655_v0 }
  0x57 PF: > { %v203_v1 = vld [vmem:[%s809_s27] sm:$0xff]  ;;  %v204_v2 = vld [vmem:[%s809_s27 + $0x8] sm:$0xff]  ;;  %v205_v3 = vld [vmem:[%s809_s27 + $0x10] sm:$0xff]  ;;  %v656_v4 = vmov 0.0|0.0   ;;  %vm657_vm0 = vmmov 0   ;;  %v658_v7 = vmov 0.0  }
  0x58   : > { %440 = vmatprep.subr.bf16.mxu0 %v656_v4  ;;  %v441_v5 = vpack.c.bf16 %v204_v2, %v203_v1  ;;  %v206_v6 = vld [vmem:[%s809_s27 + $0x18] sm:$0xff]  ;;  %437 = vmatprep.mubr.msk.f32.mxu0 %vm657_vm0, %v658_v7  ;;  %v207_v9 = vld [vmem:[%s809_s27 + $0x20] sm:$0xff]  ;;  %v208_v10 = vld [vmem:[%s809_s27 + $0x28] sm:$0xff]  ;;  %s659_s18 = smov [#allocation7]   ;;  %p480_p12 = scmp.eq.s32.totalorder %s694_s13, 1 }
  0x59   : > { %v444_v8 = vpack.c.bf16 %v206_v6, %v205_v3  ;;  %v193_v11 = vld [vmem:[%s157_s29] sm:$0xff]  ;;  %v447_v13 = vpack.c.bf16 %v208_v10, %v207_v9  ;;  %v211_v18 = vld [vmem:[%s809_s27 + $0x40] sm:$0xff]  ;;  %v212_v19 = vld [vmem:[%s809_s27 + $0x48] sm:$0xff]  ;;  %s298_s19 = sshll.u32 %s659_s18, 4  ;;  %s299_s19 = int_to_ptr.vmem [resolvable:$true] %s298_s19 }
  0x5a   : > { %442 = vmatpush3.bf16.msra.mxu0 %v441_v5  ;;  %v194_v12 = vrot.slane %v193_v11, 4  ;;  %v209_v14 = vld [vmem:[%s809_s27 + $0x30] sm:$0xff]  ;;  %v210_v15 = vld [vmem:[%s809_s27 + $0x38] sm:$0xff]  ;;  %v453_v21 = vpack.c.bf16 %v212_v19, %v211_v18  ;;  %v215_v26 = vld [vmem:[%s809_s27 + $0x60] sm:$0xff]  ;;  %s581_s16 = scalar_lea.vmem %s299_s19, 16  ;;  %s587_s25 = scalar_lea.vmem %s299_s19, 32 }
  0x5b   : > { %443 = vmatprep.subr.bf16.mxu0 %v656_v4  ;;  %v450_v17 = vpack.c.bf16 %v210_v15, %v209_v14  ;;  %v213_v22 = vld [vmem:[%s809_s27 + $0x50] sm:$0xff]  ;;  %v214_v23 = vld [vmem:[%s809_s27 + $0x58] sm:$0xff]  ;;  %v216_v27 = vld [vmem:[%s809_s27 + $0x68] sm:$0xff]  ;;  %p582_p5 = scmp.ne.s32.totalorder %s299_s19, %s581_s16  ;;  %p588_p3 = scmp.lt.s32.totalorder %s299_s19, %s299_s19 }
  0x5c   : > { %v195_v16 = vadd.f32 %v194_v12, %v193_v11  ;;  %v456_v25 = vpack.c.bf16 %v214_v23, %v213_v22  ;;  %v459_v29 = vpack.c.bf16 %v216_v27, %v215_v26  ;;  %v217_v30 = vld [vmem:[%s809_s27 + $0x70] sm:$0xff]  ;;  %v218_v31 = vld [vmem:[%s809_s27 + $0x78] sm:$0xff]  ;;  %v202_v35 = vld [vmem:[#allocation7] sm:$0x1]  ;;  %p589_p0 = scmp.lt.s32.totalorder %s587_s25, %s581_s16 }
  0x5d   : > { %v462_v33 = vpack.c.bf16 %v218_v31, %v217_v30  ;;  %p583_p6 = pnand %p582_p5, %p480_p12 }
  0x5e   : > { %445 = vmatpush3.bf16.msra.mxu0 %v444_v8  ;;  %v196_v20 = vrot.slane %v195_v16, 2  ;;  %p590_p4 = por %p589_p0, %p588_p3 }
  0x5f   : > { %446 = vmatprep.subr.bf16.mxu0 %v656_v4  ;;  %p584_p2 = pneg %p583_p6 }
  0x60   : > { %v197_v24 = vadd.f32 %v196_v20, %v195_v16 }
  0x61   : > { %p591_p9 = pnand %p590_p4, %p584_p2 }
  0x62   : > { %448 = vmatpush3.bf16.msra.mxu0 %v447_v13  ;;  %v198_v28 = vrot.slane %v197_v24, 1 }
  0x63   : > { %449 = vmatprep.subr.bf16.mxu0 %v656_v4 }
  0x64   : > { %v199_v32 = vadd.f32 %v198_v28, %v197_v24 }
  0x66   : > { %451 = vmatpush3.bf16.msra.mxu0 %v450_v17  ;;  %v201_v34 = vmul.f32 0.125, %v199_v32 }
  0x67   : > { %452 = vmatprep.subr.bf16.mxu0 %v656_v4 }
  0x6a   : > { %454 = vmatpush3.bf16.msra.mxu0 %v453_v21 }
  0x6b   : > { %455 = vmatprep.subr.bf16.mxu0 %v656_v4 }
  0x6e   : > { %457 = vmatpush3.bf16.msra.mxu0 %v456_v25 }
  0x6f   : > { %458 = vmatprep.subr.bf16.mxu0 %v656_v4 }
  0x72   : > { %460 = vmatpush3.bf16.msra.mxu0 %v459_v29 }
  0x73   : > { %461 = vmatprep.subr.bf16.mxu0 %v656_v4 }
  0x76   : > { %463 = vmatpush3.bf16.msra.mxu0 %v462_v33 }
  0x79   : > { %438 = vmatmul.mubr.f32.vlgmr.msra.gmra.mrb[0].mxu0 %v201_v34 }
 0x14c   : > { %v285_v36 = vpop.f32.mrb[0].mxu0 }
 0x14d   : > { %v289_v37 = vadd.f32 %v285_v36, %v202_v35  ;;  %v439_v38 = vpop.f32.mrb[1].mxu0 }
 0x14f   : > { %290 = vst [vmem:[#allocation7] sm:$0x1] %v289_v37 }
 0x150   : > { %594 = shalt.err (!%p591_p9)
}
 0x151   : > { %s595_s28 = scalar_lea.hbm %s870_s2, 16 }
 0x152   : > { %p596_p10 = scmp.ne.s32.totalorder %s870_s2, %s595_s28  ;;  %p601_p1 = scmp.lt.u32.totalorder %s595_s28, %s870_s2 }
 0x154   : > { %p597_p11 = pnand %p596_p10, %p480_p12 }
 0x156   : > { %p598_p13 = pneg %p597_p11 }
 0x158   : > { %p603_p7 = pnand %p601_p1, %p598_p13 }
 0x15a   : > { %606 = shalt.err (!%p603_p7)
}
 0x15b   : > { %469 = dma.vmem_to_hbm [thread:$0]  (%p480_p12), %s299_s19, 16, %s870_s2, [#allocation4]  }
 0x15c   : > { %632 = dma.done.wait (%p480_p12), [#allocation4], 16  }
 0x15d   : > { %634 = vsyncadd (%p480_p12), [#allocation4], 4294967280 }
 0x15e PF: > { %p16_p8 = scmp.ge.s32.totalorder %s697_s14, 4   ;;  %s878_s9 = smov %s641_s10 }
 0x15f   : > { %s879_s10 = smov %s645_s11  ;;  %s880_s11 = smov %s707_s17 }
 0x160   : > { %s881_s12 = smov %s697_s14  ;;  %18 = sbr.rel (!%p16_p8) target bundleno = 6 (0x6), region = 82 }
 0x167   :  { %311 = vsyncpa [#allocation3], 1 }
 0x168   :  { %313 = vsyncpa [#allocation3 + $0x1], 1 }
 0x169   :  { %314 = vsyncpa [#allocation6], 1 }
 0x16a   :  { %316 = vsyncpa [#allocation6 + $0x1], 1 }
 0x16b   :  { %317 = vsyncpa [#allocation4], 1 }
 0x16c   :  { %319 = vsyncpa [#allocation4 + $0x1], 1 }

</bundles_post_ra>
